<compile_context>
chip_gen: v5e
topology: v5e:2x2
jax: 0.10.0
libtpu: 0.0.40
codegen_flags: <defaults>
</compile_context>

<pallas_src>
import functools

import jax
import jax.numpy as jnp
from jax import lax
from jax.experimental import pallas as pl
from jax.experimental.pallas import tpu as pltpu

LANES = 128
SUBLANES = 8
VREG_ELEMS = SUBLANES * LANES  # 1024


def _bce_elementwise(x, y, pos_weight):
    """Numerically-stable BCE-with-logits, per element (torch formula)."""
    softplus = jnp.log1p(jnp.exp(-jnp.abs(x))) + jnp.maximum(-x, 0.0)
    log_weight = 1.0 + (pos_weight - 1.0) * y
    return (1.0 - y) * x + log_weight * softplus


def _bce_kernel(ys_ref, yt_ref, out_ref, *, pos_weight, tiles_per_core,
                last_tile, last_tile_rows, has_phantom):
    p = pl.program_id(0)          # core axis (CORE_PARALLEL on v7x)
    k = pl.program_id(1)          # reduction axis (sequential per core)
    tile_rows = ys_ref.shape[0]
    t = p * tiles_per_core + k    # global tile id

    @pl.when(k == 0)
    def _():
        out_ref[...] = jnp.zeros_like(out_ref)

    x = ys_ref[...].astype(jnp.float32)   # logits
    y = yt_ref[...].astype(jnp.float32)   # targets (bf16 targets are lossless 0/1)

    loss = _bce_elementwise(x, y, pos_weight)

    def _reduce(v):
        # (tile_rows,128) -> (8,128): sublane-group sum only (pure VPU adds,
        # hidden under DMA).  Cross-lane reduce happens once, in the wrapper.
        return jnp.sum(v.reshape(tile_rows // SUBLANES, SUBLANES, LANES),
                       axis=0).reshape(1, SUBLANES, LANES)

    if last_tile_rows == tile_rows and not has_phantom:
        # Steady state: every tile is full and real -> unconditional, unmasked.
        out_ref[...] += _reduce(loss)
    elif last_tile_rows == tile_rows:
        # Full tiles, but phantom (clamped) tiles exist from the core split.
        @pl.when(t <= last_tile)
        def _():
            out_ref[...] += _reduce(loss)
    else:
        # Interior tiles: unmasked hot path.
        @pl.when(t < last_tile)
        def _():
            out_ref[...] += _reduce(loss)

        # Ragged last tile: tile-local row mask against a static count.  Rows
        # past the array end hold stale VMEM data; the select discards any
        # NaN/Inf produced from them before accumulation.
        @pl.when(t == last_tile)
        def _():
            row_ids = lax.broadcasted_iota(jnp.int32, (tile_rows, LANES), 0)
            out_ref[...] += _reduce(jnp.where(row_ids < last_tile_rows, loss, 0.0))
        # t > last_tile (phantom): neither branch fires -> skipped.


def _device_kind():
    try:
        return jax.devices()[0].device_kind.lower()
    except Exception:
        return ""


def bce_with_logits_loss(ypred, ytgt, pos_weight, *, max_tile_rows=None, num_cores=None):
    """Mean BCE-with-logits loss with scalar pos_weight. Returns f32 scalar."""
    assert ypred.shape == ytgt.shape, "shapes must match"
    n = ypred.size
    pos_weight = float(pos_weight)

    kind = _device_kind()
    is_v7 = "v7" in kind
    if max_tile_rows is None:
        # 4 MiB/input block generally; 8 MiB/input on v7x (64 MiB VMEM, 3.2 TB/s HBM
        # makes the fixed ~0.35us/step overhead proportionally worst there).
        max_tile_rows = 16384 if is_v7 else 8192
    if num_cores is None:
        # v5e/v6e have a single TensorCore: a 2-way split only creates phantom
        # tiles / wasted DMA there.  v7x has 2 TCs.
        num_cores = 2 if is_v7 else 1

    x_flat = ypred.reshape(-1)
    y_flat = ytgt.reshape(-1)

    # Kernel consumes the 1024-aligned prefix (free reshape, no jnp.pad copy).
    n_main = (n // VREG_ELEMS) * VREG_ELEMS
    rows = n_main // LANES                      # multiple of 8

    if rows == 0:
        # Tiny input: plain jnp is already optimal.
        total = jnp.sum(_bce_elementwise(x_flat.astype(jnp.float32),
                                         y_flat.astype(jnp.float32), pos_weight))
        return total / n

    x2d = x_flat[:n_main].reshape(rows, LANES)
    y2d = y_flat[:n_main].reshape(rows, LANES)

    if rows <= max_tile_rows:
        tile_rows = rows                        # single full-extent tile
    else:
        tile_rows = max_tile_rows               # multiple of 8 (and 16 for bf16)
    num_tiles = pl.cdiv(rows, tile_rows)
    last_tile = num_tiles - 1
    last_tile_rows = rows - last_tile * tile_rows   # multiple of 8

    ncores = max(1, min(int(num_cores), num_tiles))
    tiles_per_core = pl.cdiv(num_tiles, ncores)
    has_phantom = ncores * tiles_per_core != num_tiles

    def in_map(p, k):
        t = p * tiles_per_core + k
        return (jnp.minimum(t, last_tile), 0)   # clamp phantom tiles in-bounds

    kernel = functools.partial(
        _bce_kernel,
        pos_weight=pos_weight,
        tiles_per_core=tiles_per_core,
        last_tile=last_tile,
        last_tile_rows=last_tile_rows,
        has_phantom=has_phantom,
    )

    core_parallel = getattr(pltpu, "CORE_PARALLEL", "parallel")
    dim_sems = (core_parallel if ncores > 1 else "arbitrary", "arbitrary")
    vmem_limit = (48 if is_v7 else 32) * 1024 * 1024

    cost = pl.CostEstimate(
        flops=10 * n_main,
        transcendentals=2 * n_main,
        bytes_accessed=rows * LANES * (x2d.dtype.itemsize + y2d.dtype.itemsize)
        + ncores * SUBLANES * LANES * 4,
    )

    # NOTE: pipeline_mode=pl.Buffered(3) on the input specs can recover a few %
    # once tiles are this big; keep default double-buffering unless measured.
    partials = pl.pallas_call(
        kernel,
        out_shape=jax.ShapeDtypeStruct((ncores, SUBLANES, LANES), jnp.float32),
        grid_spec=pltpu.PrefetchScalarGridSpec(
            num_scalar_prefetch=0,
            grid=(ncores, tiles_per_core),
            in_specs=[
                pl.BlockSpec((tile_rows, LANES), in_map),
                pl.BlockSpec((tile_rows, LANES), in_map),
            ],
            # Per-core (8,128) partial sum, resident across the reduction axis.
            out_specs=pl.BlockSpec((1, SUBLANES, LANES), lambda p, k: (p, 0, 0)),
        ),
        compiler_params=pltpu.CompilerParams(
            dimension_semantics=dim_sems,
            vmem_limit_bytes=vmem_limit,
        ),
        cost_estimate=cost,
    )(x2d, y2d)

    # Single cross-lane reduce, done once outside the kernel.
    total = jnp.sum(partials)

    # Fold in the <1024-element unaligned tail with plain jnp (no pad copy).
    if n_main < n:
        xt = x_flat[n_main:].astype(jnp.float32)
        yt = y_flat[n_main:].astype(jnp.float32)
        total = total + jnp.sum(_bce_elementwise(xt, yt, pos_weight))

    return total / n


if __name__ == "__main__":
    key = jax.random.PRNGKey(0)
    k1, k2 = jax.random.split(key)
    shape = (2, 4, 16, 16)        # NCHW logits, as a conv-head would emit
    pos_weight = 2.0              # SimpleLoss(pos_weight=2.0)

    ypred = jax.random.normal(k1, shape, dtype=jnp.float32)                    # logits
    # Targets are exact 0/1, so bf16 is lossless and halves target HBM traffic.
    ytgt = jax.random.bernoulli(k2, 0.3, shape).astype(jnp.bfloat16)

    loss = bce_with_logits_loss(ypred, ytgt, pos_weight)
    jax.block_until_ready(loss)

    # Pure-JAX reference with the same (torch-equivalent) stable formula.
    y32 = ytgt.astype(jnp.float32)
    lw = 1.0 + (pos_weight - 1.0) * y32
    ref = jnp.mean(
        (1.0 - y32) * ypred
        + lw * (jnp.log1p(jnp.exp(-jnp.abs(ypred))) + jnp.maximum(-ypred, 0.0))
    )
    assert jnp.allclose(loss, ref, rtol=1e-5, atol=1e-6), (loss, ref)

    print("KERNEL_OK")
</pallas_src>

<mosaic_0001>
module attributes {stable_mosaic.version = 11 : i64} {
  func.func @_bce_kernel(%arg0: i32, %arg1: i32, %arg2: memref<16x128xf32, #tpu.memory_space<vmem>>, %arg3: memref<16x128xbf16, #tpu.memory_space<vmem>>, %arg4: memref<1x8x128xf32, #tpu.memory_space<vmem>>) attributes {dimension_semantics = [#tpu.dimension_semantics<arbitrary>, #tpu.dimension_semantics<arbitrary>], iteration_bounds = array<i64: 1, 1>, scalar_prefetch = 0 : i64, scratch_operands = 0 : i64, tpu.core_type = #tpu.core_type<tc>, window_params = [{transform_indices = @transform_0, window_bounds = array<i64: 16, 128>}, {transform_indices = @transform_1, window_bounds = array<i64: 16, 128>}, {transform_indices = @transform_2, window_bounds = array<i64: 1, 8, 128>}]} {
    %c0_i32 = arith.constant 0 : i32
    %0 = arith.cmpi eq, %arg1, %c0_i32 : i32
    %1 = arith.extui %0 : i1 to i32
    %c0_i32_0 = arith.constant 0 : i32
    %2 = arith.cmpi ne, %1, %c0_i32_0 : i32
    scf.if %2 {
      %cst_16 = arith.constant 0.000000e+00 : f32
      %31 = vector.broadcast %cst_16 : f32 to vector<1x8x128xf32>
      %c0_17 = arith.constant 0 : index
      %c0_18 = arith.constant 0 : index
      %c0_19 = arith.constant 0 : index
      %32 = vector.load %arg4[%c0_17, %c0_18, %c0_19] : memref<1x8x128xf32, #tpu.memory_space<vmem>>, vector<1x8x128xf32>
      tpu.vector_store %arg4[%c0_17, %c0_18, %c0_19], %31 {strides = array<i32>} : memref<1x8x128xf32, #tpu.memory_space<vmem>>, vector<1x8x128xf32>,
    } else {
    }
    %c0 = arith.constant 0 : index
    %c0_1 = arith.constant 0 : index
    %3 = vector.load %arg2[%c0, %c0_1] : memref<16x128xf32, #tpu.memory_space<vmem>>, vector<16x128xf32>
    %c0_2 = arith.constant 0 : index
    %c0_3 = arith.constant 0 : index
    %4 = vector.load %arg3[%c0_2, %c0_3] : memref<16x128xbf16, #tpu.memory_space<vmem>>, vector<16x128xbf16>
    %5 = arith.extf %4 : vector<16x128xbf16> to vector<16x128xf32>
    %6 = math.absf %3 : vector<16x128xf32>
    %cst = arith.constant 0.000000e+00 : f32
    %7 = vector.broadcast %cst : f32 to vector<16x128xf32>
    %8 = arith.subf %7, %6 : vector<16x128xf32>
    %9 = math.exp %8 : vector<16x128xf32>
    %10 = math.log1p %9 : vector<16x128xf32>
    %cst_4 = arith.constant 0.000000e+00 : f32
    %11 = vector.broadcast %cst_4 : f32 to vector<16x128xf32>
    %12 = arith.subf %11, %3 : vector<16x128xf32>
    %cst_5 = arith.constant 0.000000e+00 : f32
    %13 = vector.broadcast %cst_5 : f32 to vector<16x128xf32>
    %14 = arith.maximumf %12, %13 : vector<16x128xf32>
    %15 = arith.addf %10, %14 : vector<16x128xf32>
    %cst_6 = arith.constant 1.000000e+00 : f32
    %16 = vector.broadcast %cst_6 : f32 to vector<16x128xf32>
    %17 = arith.mulf %16, %5 : vector<16x128xf32>
    %cst_7 = arith.constant 1.000000e+00 : f32
    %18 = vector.broadcast %cst_7 : f32 to vector<16x128xf32>
    %19 = arith.addf %18, %17 : vector<16x128xf32>
    %cst_8 = arith.constant 1.000000e+00 : f32
    %20 = vector.broadcast %cst_8 : f32 to vector<16x128xf32>
    %21 = arith.subf %20, %5 : vector<16x128xf32>
    %22 = arith.mulf %21, %3 : vector<16x128xf32>
    %23 = arith.mulf %19, %15 : vector<16x128xf32>
    %24 = arith.addf %22, %23 : vector<16x128xf32>
    %c0_9 = arith.constant 0 : index
    %c0_10 = arith.constant 0 : index
    %c0_11 = arith.constant 0 : index
    %25 = vector.load %arg4[%c0_9, %c0_10, %c0_11] : memref<1x8x128xf32, #tpu.memory_space<vmem>>, vector<1x8x128xf32>
    %26 = vector.shape_cast %24 : vector<16x128xf32> to vector<2x8x128xf32>
    %cst_12 = arith.constant dense<0.000000e+00> : vector<8x128xf32>
    %27 = vector.multi_reduction <add>, %26, %cst_12 [0] : vector<2x8x128xf32> to vector<8x128xf32>
    %28 = vector.shape_cast %27 : vector<8x128xf32> to vector<1x8x128xf32>
    %29 = arith.addf %25, %28 : vector<1x8x128xf32>
    %c0_13 = arith.constant 0 : index
    %c0_14 = arith.constant 0 : index
    %c0_15 = arith.constant 0 : index
    %30 = vector.load %arg4[%c0_13, %c0_14, %c0_15] : memref<1x8x128xf32, #tpu.memory_space<vmem>>, vector<1x8x128xf32>
    tpu.vector_store %arg4[%c0_13, %c0_14, %c0_15], %29 {strides = array<i32>} : memref<1x8x128xf32, #tpu.memory_space<vmem>>, vector<1x8x128xf32>,
    return
  }
  func.func @transform_0(%arg0: i32, %arg1: i32) -> (i32, i32) {
    %c1_i32 = arith.constant 1 : i32
    %0 = arith.muli %arg0, %c1_i32 : i32
    %1 = arith.addi %0, %arg1 : i32
    %c0_i32 = arith.constant 0 : i32
    %2 = arith.minsi %1, %c0_i32 : i32
    %c0_i32_0 = arith.constant 0 : i32
    %c0_i32_1 = arith.constant 0 : i32
    return %2, %c0_i32_0 : i32, i32
  }
  func.func @transform_1(%arg0: i32, %arg1: i32) -> (i32, i32) {
    %c1_i32 = arith.constant 1 : i32
    %0 = arith.muli %arg0, %c1_i32 : i32
    %1 = arith.addi %0, %arg1 : i32
    %c0_i32 = arith.constant 0 : i32
    %2 = arith.minsi %1, %c0_i32 : i32
    %c0_i32_0 = arith.constant 0 : i32
    %c0_i32_1 = arith.constant 0 : i32
    return %2, %c0_i32_0 : i32, i32
  }
  func.func @transform_2(%arg0: i32, %arg1: i32) -> (i32, i32, i32) {
    %c0_i32 = arith.constant 0 : i32
    %c0_i32_0 = arith.constant 0 : i32
    %c0_i32_1 = arith.constant 0 : i32
    return %arg0, %c0_i32, %c0_i32_0 : i32, i32, i32
  }
}

</mosaic_0001>

<bundles_post_ra>
// kernel: tpu_custom_call.1
= control target key start
LH: loop header
LB: loop body
LE: loop exit
PB: predicated region body
PF: predicated region fallthrough
CT: control target
= control target key end

     0   :  { %7 = vsyncpa [#allocation3], 0  ;;  %s272_s0 = inlined_call_operand.hbm [shape: f32[16,128], index: 0, kind: input, shape index: {}]   ;;  %s273_s1 = inlined_call_operand.hbm [shape: bf16[16,128], index: 1, kind: input, shape index: {}]   ;;  %s274_s2 = inlined_call_operand.hbm [shape: f32[1,8,128], index: 2, kind: output, shape index: {}]  }
   0x1   :  { %8 = vsyncpa [#allocation6], 0 }
   0x2   :  { %9 = vsyncpa [#allocation4], 0  ;;  %s20_s11 = sshll.u32 %s272_s0, 4  ;;  %s241_s12 = smov [#allocation2]   ;;  %s21_s11 = int_to_ptr.hbm [resolvable:$true] %s20_s11 }
   0x3   :  { %s22_s13 = sshll.u32 %s241_s12, 4  ;;  %s39_s16 = sshll.u32 %s273_s1, 4  ;;  %s23_s13 = int_to_ptr.vmem [resolvable:$true] %s22_s13  ;;  %s40_s16 = int_to_ptr.hbm [resolvable:$true] %s39_s16 }
   0x4   :  { %s242_s17 = smov 128   ;;  %s243_s18 = smov 8  }
   0x5   :  { %28 = dma.hbm_to_vmem [thread:$0]  %s21_s11, 256, %s23_s13, [#allocation3], %s242_s17, %s242_s17, %s243_s18  }
   0x6   :  { %s244_s19 = smov [#allocation5]   ;;  %s245_s21 = smov 64  }
   0x7   :  { %s41_s20 = sshll.u32 %s244_s19, 4  ;;  %s246_s22 = smov 4   ;;  %s42_s20 = int_to_ptr.vmem [resolvable:$true] %s41_s20 }
   0x8   :  { %47 = dma.hbm_to_vmem [thread:$0]  %s40_s16, 128, %s42_s20, [#allocation6], %s245_s21, %s245_s21, %s246_s22  }
   0x9   :  { %235 = dma.done.wait [#allocation3], 256  }
   0xa   :  { %236 = vsyncadd [#allocation3], 4294967040 }
   0xb   :  { %237 = dma.done.wait [#allocation6], 128  }
   0xc   :  { %238 = vsyncadd [#allocation6], 4294967168  ;;  %v69_v0 = vld [vmem:[#allocation2] sm:$0xff]  ;;  %v70_v1 = vld [vmem:[#allocation2 + $0x8] sm:$0xff]  ;;  %s247_s0 = smov [#allocation7]   ;;  %s128_s25 = sshll.u32 %s274_s2, 4  ;;  %s129_s25 = int_to_ptr.hbm [resolvable:$true] %s128_s25 }
   0xd   :  { %v75_v2 = vand.u32 2147483647, %v69_v0  ;;  %v76_v3 = vand.u32 2147483647, %v70_v1  ;;  %v144_v12 = vld [vmem:[#allocation5] sm:$0xff]   ;;  %v101_v19 = vsub.f32 0.0, %v69_v0 }
   0xe   :  { %v145_v16 = vunpack.c.l.bf16 %v144_v12  ;;  %v146_v20 = vunpack.c.h.bf16 %v144_v12  ;;  %v102_v22 = vsub.f32 0.0, %v70_v1  ;;  %s126_s1 = sshll.u32 %s247_s0, 4  ;;  %s127_s1 = int_to_ptr.vmem [resolvable:$true] %s126_s1 }
   0xf   :  { %v77_v4 = vsub.f32 0.0, %v75_v2  ;;  %v78_v5 = vsub.f32 0.0, %v76_v3  ;;  %v103_v26 = vmax.f32 %v101_v19, 0.0 }
  0x10   :  { %v109_v27 = vsub.f32 1.0, %v145_v16  ;;  %v104_v30 = vmax.f32 %v102_v22, 0.0  ;;  %v110_v31 = vsub.f32 1.0, %v146_v20  ;;  %v107_v33 = vadd.f32 1.0, %v145_v16 }
  0x11   :  { %v79_v6 = vmul.f32 1.442695, %v77_v4  ;;  %v81_v7 = vmul.f32 1.442695, %v78_v5  ;;  %v108_v35 = vadd.f32 1.0, %v146_v20 }
  0x12   :  { %v111_v38 = vmul.f32 %v109_v27, %v69_v0  ;;  %v112_v40 = vmul.f32 %v110_v31, %v70_v1 }
  0x13   :  { %155 = vpow2.f32 %v79_v6 }
  0x14   :  { %157 = vpow2.f32 %v81_v7 }
  0x19   :  { %v156_v8 = vpop.eup %155 }
  0x1a   :  { %v158_v9 = vpop.eup %157  ;;  %v83_v10 = vadd.f32 1.0, %v156_v8  ;;  %v86_v11 = vmul.f32 -0.5, %v156_v8  ;;  %v89_v17 = vand.u32 2147483647, %v156_v8 }
  0x1b   :  { %v92_v13 = vadd.f32 1.0, %v158_v9  ;;  %v95_v14 = vmul.f32 -0.5, %v158_v9  ;;  %v98_v21 = vand.u32 2147483647, %v158_v9 }
  0x1c   :  { %159 = vlog2.f32 %v83_v10  ;;  %v87_v15 = vadd.f32 1.0, %v86_v11  ;;  %vm90_vm0 = vcmp.lt.f32.partialorder %v89_v17, 0.0004427343 }
  0x1d   :  { %161 = vlog2.f32 %v92_v13  ;;  %v96_v18 = vadd.f32 1.0, %v95_v14  ;;  %vm99_vm1 = vcmp.lt.f32.partialorder %v98_v21, 0.0004427343 }
  0x1e   :  { %v88_v23 = vmul.f32 %v156_v8, %v87_v15 }
  0x1f   :  { %v97_v25 = vmul.f32 %v158_v9, %v96_v18 }
  0x22   :  { %v160_v24 = vpop.eup %159 }
  0x23   :  { %v162_v28 = vpop.eup %161  ;;  %v85_v29 = vmul.f32 0.6931472, %v160_v24 }
  0x24   :  { %v94_v32 = vmul.f32 0.6931472, %v162_v28 }
  0x25   :  { %v91_v34 = vsel %vm90_vm0, %v88_v23, %v85_v29 }
  0x26   :  { %v100_v36 = vsel %vm99_vm1, %v97_v25, %v94_v32  ;;  %v105_v37 = vadd.f32 %v103_v26, %v91_v34 }
  0x27   :  { %v106_v39 = vadd.f32 %v104_v30, %v100_v36 }
  0x28   :  { %v113_v41 = vmul.f32 %v107_v33, %v105_v37 }
  0x29   :  { %v114_v42 = vmul.f32 %v108_v35, %v106_v39 }
  0x2a   :  { %v115_v43 = vadd.f32 %v113_v41, %v111_v38 }
  0x2b   :  { %v116_v44 = vadd.f32 %v114_v42, %v112_v40 }
  0x2d   :  { %v118_v45 = vadd.f32 %v116_v44, %v115_v43 }
  0x2f   :  { %120 = vst [vmem:[#allocation7] sm:$0xff] %v118_v45 }
  0x30   :  { %131 = dma.vmem_to_hbm [thread:$0]  %s127_s1, 128, %s129_s25, [#allocation4]  }
  0x31   :  { %239 = dma.done.wait [#allocation4], 128  }
  0x32   :  { %240 = vsyncadd [#allocation4], 4294967168 }
  0x33   :  { %136 = vsyncpa [#allocation3], 1 }
  0x34   :  { %137 = vsyncpa [#allocation6], 1 }
  0x35   :  { %138 = vsyncpa [#allocation4], 1 }

</bundles_post_ra>
